<compile_context>
chip_gen: v7x
topology: tpu7x:2x2x1
jax: 0.10.0
libtpu: 0.0.40
codegen_flags: <defaults>
</compile_context>

<pallas_src>
import functools

import jax
import jax.numpy as jnp
from jax.experimental import pallas as pl
from jax.experimental.pallas import tpu as pltpu


_LANE = 128          # lane (last-dim) padding granularity
_SUBLANE = 8         # sublane (batch) granularity
_MAX_TILE_M = 2048   # hard ceiling on batch rows per grid step


def _round_up(x, m):
    return (x + m - 1) // m * m


def _vmem_cap_bytes():
    """Per-generation scoped-VMEM soft cap.
    v5e/v6e have 128 MiB physical VMEM -> allow ~100 MiB.
    v7x (and unknown) -> 48 MiB, safe within 64 MiB/TC."""
    try:
        kind = jax.devices()[0].device_kind.lower()
    except Exception:
        kind = ""
    if "v5" in kind or "v6" in kind:
        return 100 * 1024 * 1024
    return 48 * 1024 * 1024


def _ffn_kernel(*refs, num_layers):
    """Fused FFN on one batch tile.

    refs layout:
      refs[0]                        x tile                  (tile_m, in_pad)
      refs[1 + 2*l], refs[2 + 2*l]   weight / bias of layer l (VMEM-resident)
      refs[-1]                       output tile             (tile_m, out_pad)
    """
    x_ref = refs[0]
    o_ref = refs[-1]
    wb = refs[1:-1]

    # bf16 operands into the MXU (2-3x throughput vs emulated f32 matmul on
    # v6e/v7x), f32 accumulation + f32 epilogue.
    h = x_ref[...].astype(jnp.bfloat16)
    for layer in range(num_layers):
        w = wb[2 * layer][...]                      # bf16 (K_pad, N_pad)
        b = wb[2 * layer + 1][...]                  # f32  (1, N_pad), broadcasts
        acc = jnp.dot(h, w, preferred_element_type=jnp.float32) + b
        if layer < num_layers - 1:
            h = jnp.maximum(acc, 0.0).astype(jnp.bfloat16)   # ReLU (VPU)
            # TODO(synk): nn.Dropout() after hidden layer index 1 is identity in
            # eval mode; training-mode random masking is not implemented.
        else:
            h = jax.nn.sigmoid(acc)                 # logistic -> EUP slot
    o_ref[...] = h.astype(o_ref.dtype)


def prepare_ffn_params(params):
    """Pad every feature dim to a multiple of 128 lanes and cast weights to bf16.

    Done ONCE (at load/init time), not per forward call, so the forward wrapper
    adds no parameter-sized HBM traffic.
    params = [(W0, b0), ..., (Wf, bf)], W: [in, out], b: [out]."""
    sizes = [params[0][0].shape[0]] + [w.shape[1] for (w, _) in params]
    padded_sizes = [_round_up(s, _LANE) for s in sizes]
    padded = []
    for (w, b), k_pad, n_pad in zip(params, padded_sizes[:-1], padded_sizes[1:]):
        k, n = w.shape
        w_p = (jnp.zeros((k_pad, n_pad), jnp.bfloat16)
               .at[:k, :n].set(w.astype(jnp.bfloat16)))
        b_p = (jnp.zeros((1, n_pad), jnp.float32)
               .at[0, :n].set(b.astype(jnp.float32)))
        padded.append((w_p, b_p))
    # Zero padding is forward-invariant: padded weight rows/cols and padded bias
    # lanes are 0, so padded activation lanes stay 0 through every ReLU layer;
    # padded sigmoid output lanes (=0.5) are sliced off in the wrapper.
    return {"params": padded, "sizes": sizes, "padded_sizes": padded_sizes}


def ffn_forward(prepared, x):
    """Fused forward pass using pre-padded params from prepare_ffn_params."""
    padded_params = prepared["params"]
    sizes = prepared["sizes"]
    padded_sizes = prepared["padded_sizes"]
    num_layers = len(padded_params)

    batch, in_features = x.shape
    assert in_features == sizes[0], "input feature dim mismatch"
    out_features = sizes[-1]
    in_pad, out_pad = padded_sizes[0], padded_sizes[-1]

    # ---- VMEM-budget-driven tile_m and vmem limit -----------------------------
    cap = _vmem_cap_bytes()
    weight_bytes = sum(int(w.size) * w.dtype.itemsize + int(b.size) * b.dtype.itemsize
                       for (w, b) in padded_params)
    x_itemsize = jnp.dtype(x.dtype).itemsize
    max_pad = max(padded_sizes)
    # per-batch-row: double-buffered x/out tiles + rough intermediate headroom.
    row_bytes = 2 * (in_pad + out_pad) * x_itemsize + 6 * max_pad
    avail = max(cap - weight_bytes - (1 << 20), row_bytes * _SUBLANE)
    tile_m = min(_MAX_TILE_M,
                 _round_up(batch, _SUBLANE),
                 max(_SUBLANE, (avail // row_bytes) // _SUBLANE * _SUBLANE))
    grid = (pl.cdiv(batch, tile_m),)   # ragged last block handled by Pallas
    vmem_limit = int(min(cap, max(16 << 20,
                                  2 * weight_bytes + 4 * tile_m * row_bytes + (4 << 20))))
    # TODO(synk): if the resident weight stack alone exceeds the per-core VMEM cap
    # (very large layers on v7x), stream weight slabs over a K/layer grid axis
    # instead of full residency; not needed at these sizes.

    # ---- only lane-pad the feature dim of x (no batch padding, no batch slice) --
    x_p = x if in_features == in_pad else jnp.pad(x, ((0, 0), (0, in_pad - in_features)))

    flat_wb = []
    for (w_p, b_p) in padded_params:
        flat_wb.extend([w_p, b_p])

    kernel = functools.partial(_ffn_kernel, num_layers=num_layers)

    def _run(single_buffer_weights):
        in_specs = [pl.BlockSpec((tile_m, in_pad), lambda i: (i, 0))]
        for (w_p, b_p) in padded_params:
            if single_buffer_weights:
                # Constant index_map -> block never changes; one VMEM buffer is
                # enough (default pipelining would waste 2x weight VMEM).
                in_specs.append(pl.BlockSpec(w_p.shape, lambda i: (0, 0),
                                             pipeline_mode=pl.Buffered(1)))
                in_specs.append(pl.BlockSpec(b_p.shape, lambda i: (0, 0),
                                             pipeline_mode=pl.Buffered(1)))
            else:
                in_specs.append(pl.BlockSpec(w_p.shape, lambda i: (0, 0)))
                in_specs.append(pl.BlockSpec(b_p.shape, lambda i: (0, 0)))
        return pl.pallas_call(
            kernel,
            out_shape=jax.ShapeDtypeStruct((batch, out_pad), x.dtype),
            grid=grid,
            in_specs=in_specs,
            out_specs=pl.BlockSpec((tile_m, out_pad), lambda i: (i, 0)),
            compiler_params=pltpu.CompilerParams(
                dimension_semantics=("parallel",),   # megacore sharding on v7x
                vmem_limit_bytes=vmem_limit,
            ),
        )(x_p, *flat_wb)

    try:
        out_p = _run(True)
    except Exception:
        # Fallback: default double-buffering if this jax/Mosaic version rejects
        # Buffered(1) on a top-level pallas_call BlockSpec. Same semantics.
        out_p = _run(False)

    return out_p[:, :out_features] if out_features != out_pad else out_p


def init_ffn_params(key, layer_arch, input_size, output_size, dtype=jnp.float32):
    """uniform(-1/sqrt(fan_in), 1/sqrt(fan_in)) init, matching nn.Linear's default."""
    sizes = [input_size] + list(layer_arch) + [output_size]
    params = []
    for fan_in, fan_out in zip(sizes[:-1], sizes[1:]):
        key, kw, kb = jax.random.split(key, 3)
        bound = 1.0 / jnp.sqrt(jnp.asarray(fan_in, dtype))
        w = jax.random.uniform(kw, (fan_in, fan_out), dtype, -bound, bound)
        b = jax.random.uniform(kb, (fan_out,), dtype, -bound, bound)
        params.append((w, b))
    return params


if __name__ == "__main__":
    # FFN(layer_arch=[32, 32], input_size=16, output_size=8) on a batch of 8.
    layer_arch = [32, 32]
    input_size = 16
    output_size = 8
    batch = 8

    key = jax.random.PRNGKey(0)
    key, kx = jax.random.split(key)
    x = jax.random.normal(kx, (batch, input_size), dtype=jnp.float32)
    params = init_ffn_params(key, layer_arch, input_size, output_size)

    prepared = prepare_ffn_params(params)      # pad + cast ONCE (not per forward)
    out = ffn_forward(prepared, x)
    out = jax.block_until_ready(out)
    assert out.shape == (batch, output_size)

    # Reference 1: same bf16-operand / f32-accumulate math as the kernel.
    h = x.astype(jnp.bfloat16)
    for w, b in params[:-1]:
        acc = jnp.dot(h, w.astype(jnp.bfloat16),
                      preferred_element_type=jnp.float32) + b.astype(jnp.float32)
        h = jnp.maximum(acc, 0.0).astype(jnp.bfloat16)
    wf, bf = params[-1]
    ref_bf16 = jax.nn.sigmoid(
        jnp.dot(h, wf.astype(jnp.bfloat16), preferred_element_type=jnp.float32)
        + bf.astype(jnp.float32))
    assert jnp.allclose(out, ref_bf16, atol=2e-3, rtol=2e-3)

    # Reference 2: full-precision module semantics (looser tol: bf16 MXU path).
    h = x
    for w, b in params[:-1]:
        h = jnp.maximum(jnp.dot(h, w, precision=jax.lax.Precision.HIGHEST) + b, 0.0)
    ref_f32 = jax.nn.sigmoid(
        jnp.dot(h, params[-1][0], precision=jax.lax.Precision.HIGHEST) + params[-1][1])
    assert jnp.allclose(out, ref_f32, atol=3e-2, rtol=3e-2)

    print("KERNEL_OK")
</pallas_src>

<mosaic_0001>
module attributes {stable_mosaic.version = 11 : i64} {
  func.func @_ffn_kernel(%arg0: i32, %arg1: memref<8x128xf32, #tpu.memory_space<vmem>>, %arg2: memref<128x128xbf16, #tpu.memory_space<vmem>>, %arg3: memref<1x128xf32, #tpu.memory_space<vmem>>, %arg4: memref<128x128xbf16, #tpu.memory_space<vmem>>, %arg5: memref<1x128xf32, #tpu.memory_space<vmem>>, %arg6: memref<128x128xbf16, #tpu.memory_space<vmem>>, %arg7: memref<1x128xf32, #tpu.memory_space<vmem>>, %arg8: memref<8x128xf32, #tpu.memory_space<vmem>>) attributes {dimension_semantics = [#tpu.dimension_semantics<parallel>], iteration_bounds = array<i64: 1>, scalar_prefetch = 0 : i64, scratch_operands = 0 : i64, tpu.core_type = #tpu.core_type<tc>, window_params = [{transform_indices = @transform_0, window_bounds = array<i64: 8, 128>}, {pipeline_mode = #tpu.pipeline_mode<synchronous>, transform_indices = @transform_1, window_bounds = array<i64: 128, 128>}, {pipeline_mode = #tpu.pipeline_mode<synchronous>, transform_indices = @transform_2, window_bounds = array<i64: 1, 128>}, {pipeline_mode = #tpu.pipeline_mode<synchronous>, transform_indices = @transform_3, window_bounds = array<i64: 128, 128>}, {pipeline_mode = #tpu.pipeline_mode<synchronous>, transform_indices = @transform_4, window_bounds = array<i64: 1, 128>}, {pipeline_mode = #tpu.pipeline_mode<synchronous>, transform_indices = @transform_5, window_bounds = array<i64: 128, 128>}, {pipeline_mode = #tpu.pipeline_mode<synchronous>, transform_indices = @transform_6, window_bounds = array<i64: 1, 128>}, {transform_indices = @transform_7, window_bounds = array<i64: 8, 128>}]} {
    %c0 = arith.constant 0 : index
    %c0_0 = arith.constant 0 : index
    %0 = vector.load %arg1[%c0, %c0_0] : memref<8x128xf32, #tpu.memory_space<vmem>>, vector<8x128xf32>
    %1 = arith.truncf %0 : vector<8x128xf32> to vector<8x128xbf16>
    %c0_1 = arith.constant 0 : index
    %c0_2 = arith.constant 0 : index
    %2 = vector.load %arg2[%c0_1, %c0_2] : memref<128x128xbf16, #tpu.memory_space<vmem>>, vector<128x128xbf16>
    %c0_3 = arith.constant 0 : index
    %c0_4 = arith.constant 0 : index
    %3 = vector.load %arg3[%c0_3, %c0_4] : memref<1x128xf32, #tpu.memory_space<vmem>>, vector<1x128xf32>
    %cst = arith.constant dense<0.000000e+00> : vector<8x128xf32>
    %4 = tpu.matmul %1, %2, %cst {dimension_numbers = #tpu.dot_dimension_numbers<[1], [0], [0], [1], [0, 0, 1, 1], [], []>} : vector<8x128xbf16>, vector<128x128xbf16>, vector<8x128xf32> -> vector<8x128xf32>
    %5 = vector.broadcast %3 : vector<1x128xf32> to vector<8x128xf32>
    %6 = arith.addf %4, %5 : vector<8x128xf32>
    %cst_5 = arith.constant 0.000000e+00 : f32
    %7 = vector.broadcast %cst_5 : f32 to vector<8x128xf32>
    %8 = arith.maximumf %6, %7 : vector<8x128xf32>
    %9 = arith.truncf %8 : vector<8x128xf32> to vector<8x128xbf16>
    %c0_6 = arith.constant 0 : index
    %c0_7 = arith.constant 0 : index
    %10 = vector.load %arg4[%c0_6, %c0_7] : memref<128x128xbf16, #tpu.memory_space<vmem>>, vector<128x128xbf16>
    %c0_8 = arith.constant 0 : index
    %c0_9 = arith.constant 0 : index
    %11 = vector.load %arg5[%c0_8, %c0_9] : memref<1x128xf32, #tpu.memory_space<vmem>>, vector<1x128xf32>
    %cst_10 = arith.constant dense<0.000000e+00> : vector<8x128xf32>
    %12 = tpu.matmul %9, %10, %cst_10 {dimension_numbers = #tpu.dot_dimension_numbers<[1], [0], [0], [1], [0, 0, 1, 1], [], []>} : vector<8x128xbf16>, vector<128x128xbf16>, vector<8x128xf32> -> vector<8x128xf32>
    %13 = vector.broadcast %11 : vector<1x128xf32> to vector<8x128xf32>
    %14 = arith.addf %12, %13 : vector<8x128xf32>
    %cst_11 = arith.constant 0.000000e+00 : f32
    %15 = vector.broadcast %cst_11 : f32 to vector<8x128xf32>
    %16 = arith.maximumf %14, %15 : vector<8x128xf32>
    %17 = arith.truncf %16 : vector<8x128xf32> to vector<8x128xbf16>
    %c0_12 = arith.constant 0 : index
    %c0_13 = arith.constant 0 : index
    %18 = vector.load %arg6[%c0_12, %c0_13] : memref<128x128xbf16, #tpu.memory_space<vmem>>, vector<128x128xbf16>
    %c0_14 = arith.constant 0 : index
    %c0_15 = arith.constant 0 : index
    %19 = vector.load %arg7[%c0_14, %c0_15] : memref<1x128xf32, #tpu.memory_space<vmem>>, vector<1x128xf32>
    %cst_16 = arith.constant dense<0.000000e+00> : vector<8x128xf32>
    %20 = tpu.matmul %17, %18, %cst_16 {dimension_numbers = #tpu.dot_dimension_numbers<[1], [0], [0], [1], [0, 0, 1, 1], [], []>} : vector<8x128xbf16>, vector<128x128xbf16>, vector<8x128xf32> -> vector<8x128xf32>
    %21 = vector.broadcast %19 : vector<1x128xf32> to vector<8x128xf32>
    %22 = arith.addf %20, %21 : vector<8x128xf32>
    %23 = arith.negf %22 : vector<8x128xf32>
    %24 = math.exp %23 : vector<8x128xf32>
    %cst_17 = arith.constant 1.000000e+00 : f32
    %25 = vector.broadcast %cst_17 : f32 to vector<8x128xf32>
    %26 = arith.addf %25, %24 : vector<8x128xf32>
    %27 = arith.divf %25, %26 : vector<8x128xf32>
    %c0_18 = arith.constant 0 : index
    %c0_19 = arith.constant 0 : index
    %28 = vector.load %arg8[%c0_18, %c0_19] : memref<8x128xf32, #tpu.memory_space<vmem>>, vector<8x128xf32>
    tpu.vector_store %arg8[%c0_18, %c0_19], %27 {strides = array<i32>} : memref<8x128xf32, #tpu.memory_space<vmem>>, vector<8x128xf32>,
    return
  }
  func.func @transform_0(%arg0: i32) -> (i32, i32) {
    %c0_i32 = arith.constant 0 : i32
    %c0_i32_0 = arith.constant 0 : i32
    return %arg0, %c0_i32 : i32, i32
  }
  func.func @transform_1(%arg0: i32) -> (i32, i32) {
    %c0_i32 = arith.constant 0 : i32
    %c0_i32_0 = arith.constant 0 : i32
    %c0_i32_1 = arith.constant 0 : i32
    return %c0_i32, %c0_i32_0 : i32, i32
  }
  func.func @transform_2(%arg0: i32) -> (i32, i32) {
    %c0_i32 = arith.constant 0 : i32
    %c0_i32_0 = arith.constant 0 : i32
    %c0_i32_1 = arith.constant 0 : i32
    return %c0_i32, %c0_i32_0 : i32, i32
  }
  func.func @transform_3(%arg0: i32) -> (i32, i32) {
    %c0_i32 = arith.constant 0 : i32
    %c0_i32_0 = arith.constant 0 : i32
    %c0_i32_1 = arith.constant 0 : i32
    return %c0_i32, %c0_i32_0 : i32, i32
  }
  func.func @transform_4(%arg0: i32) -> (i32, i32) {
    %c0_i32 = arith.constant 0 : i32
    %c0_i32_0 = arith.constant 0 : i32
    %c0_i32_1 = arith.constant 0 : i32
    return %c0_i32, %c0_i32_0 : i32, i32
  }
  func.func @transform_5(%arg0: i32) -> (i32, i32) {
    %c0_i32 = arith.constant 0 : i32
    %c0_i32_0 = arith.constant 0 : i32
    %c0_i32_1 = arith.constant 0 : i32
    return %c0_i32, %c0_i32_0 : i32, i32
  }
  func.func @transform_6(%arg0: i32) -> (i32, i32) {
    %c0_i32 = arith.constant 0 : i32
    %c0_i32_0 = arith.constant 0 : i32
    %c0_i32_1 = arith.constant 0 : i32
    return %c0_i32, %c0_i32_0 : i32, i32
  }
  func.func @transform_7(%arg0: i32) -> (i32, i32) {
    %c0_i32 = arith.constant 0 : i32
    %c0_i32_0 = arith.constant 0 : i32
    return %arg0, %c0_i32 : i32, i32
  }
}

module attributes {stable_mosaic.version = 11 : i64} {
  func.func @_ffn_kernel(%arg0: i32, %arg1: memref<8x128xf32, #tpu.memory_space<vmem>>, %arg2: memref<128x128xbf16, #tpu.memory_space<vmem>>, %arg3: memref<1x128xf32, #tpu.memory_space<vmem>>, %arg4: memref<128x128xbf16, #tpu.memory_space<vmem>>, %arg5: memref<1x128xf32, #tpu.memory_space<vmem>>, %arg6: memref<128x128xbf16, #tpu.memory_space<vmem>>, %arg7: memref<1x128xf32, #tpu.memory_space<vmem>>, %arg8: memref<8x128xf32, #tpu.memory_space<vmem>>) attributes {dimension_semantics = [#tpu.dimension_semantics<parallel>], iteration_bounds = array<i64: 1>, scalar_prefetch = 0 : i64, scratch_operands = 0 : i64, tpu.core_type = #tpu.core_type<tc>, window_params = [{transform_indices = @transform_0, window_bounds = array<i64: 8, 128>}, {pipeline_mode = #tpu.pipeline_mode<synchronous>, transform_indices = @transform_1, window_bounds = array<i64: 128, 128>}, {pipeline_mode = #tpu.pipeline_mode<synchronous>, transform_indices = @transform_2, window_bounds = array<i64: 1, 128>}, {pipeline_mode = #tpu.pipeline_mode<synchronous>, transform_indices = @transform_3, window_bounds = array<i64: 128, 128>}, {pipeline_mode = #tpu.pipeline_mode<synchronous>, transform_indices = @transform_4, window_bounds = array<i64: 1, 128>}, {pipeline_mode = #tpu.pipeline_mode<synchronous>, transform_indices = @transform_5, window_bounds = array<i64: 128, 128>}, {pipeline_mode = #tpu.pipeline_mode<synchronous>, transform_indices = @transform_6, window_bounds = array<i64: 1, 128>}, {transform_indices = @transform_7, window_bounds = array<i64: 8, 128>}]} {
    %c0 = arith.constant 0 : index
    %c0_0 = arith.constant 0 : index
    %0 = vector.load %arg1[%c0, %c0_0] : memref<8x128xf32, #tpu.memory_space<vmem>>, vector<8x128xf32>
    %1 = arith.truncf %0 : vector<8x128xf32> to vector<8x128xbf16>
    %c0_1 = arith.constant 0 : index
    %c0_2 = arith.constant 0 : index
    %2 = vector.load %arg2[%c0_1, %c0_2] : memref<128x128xbf16, #tpu.memory_space<vmem>>, vector<128x128xbf16>
    %c0_3 = arith.constant 0 : index
    %c0_4 = arith.constant 0 : index
    %3 = vector.load %arg3[%c0_3, %c0_4] : memref<1x128xf32, #tpu.memory_space<vmem>>, vector<1x128xf32>
    %cst = arith.constant dense<0.000000e+00> : vector<8x128xf32>
    %4 = tpu.matmul %1, %2, %cst {dimension_numbers = #tpu.dot_dimension_numbers<[1], [0], [0], [1], [0, 0, 1, 1], [], []>} : vector<8x128xbf16>, vector<128x128xbf16>, vector<8x128xf32> -> vector<8x128xf32>
    %5 = vector.broadcast %3 : vector<1x128xf32> to vector<8x128xf32>
    %6 = arith.addf %4, %5 : vector<8x128xf32>
    %cst_5 = arith.constant 0.000000e+00 : f32
    %7 = vector.broadcast %cst_5 : f32 to vector<8x128xf32>
    %8 = arith.maximumf %6, %7 : vector<8x128xf32>
    %9 = arith.truncf %8 : vector<8x128xf32> to vector<8x128xbf16>
    %c0_6 = arith.constant 0 : index
    %c0_7 = arith.constant 0 : index
    %10 = vector.load %arg4[%c0_6, %c0_7] : memref<128x128xbf16, #tpu.memory_space<vmem>>, vector<128x128xbf16>
    %c0_8 = arith.constant 0 : index
    %c0_9 = arith.constant 0 : index
    %11 = vector.load %arg5[%c0_8, %c0_9] : memref<1x128xf32, #tpu.memory_space<vmem>>, vector<1x128xf32>
    %cst_10 = arith.constant dense<0.000000e+00> : vector<8x128xf32>
    %12 = tpu.matmul %9, %10, %cst_10 {dimension_numbers = #tpu.dot_dimension_numbers<[1], [0], [0], [1], [0, 0, 1, 1], [], []>} : vector<8x128xbf16>, vector<128x128xbf16>, vector<8x128xf32> -> vector<8x128xf32>
    %13 = vector.broadcast %11 : vector<1x128xf32> to vector<8x128xf32>
    %14 = arith.addf %12, %13 : vector<8x128xf32>
    %cst_11 = arith.constant 0.000000e+00 : f32
    %15 = vector.broadcast %cst_11 : f32 to vector<8x128xf32>
    %16 = arith.maximumf %14, %15 : vector<8x128xf32>
    %17 = arith.truncf %16 : vector<8x128xf32> to vector<8x128xbf16>
    %c0_12 = arith.constant 0 : index
    %c0_13 = arith.constant 0 : index
    %18 = vector.load %arg6[%c0_12, %c0_13] : memref<128x128xbf16, #tpu.memory_space<vmem>>, vector<128x128xbf16>
    %c0_14 = arith.constant 0 : index
    %c0_15 = arith.constant 0 : index
    %19 = vector.load %arg7[%c0_14, %c0_15] : memref<1x128xf32, #tpu.memory_space<vmem>>, vector<1x128xf32>
    %cst_16 = arith.constant dense<0.000000e+00> : vector<8x128xf32>
    %20 = tpu.matmul %17, %18, %cst_16 {dimension_numbers = #tpu.dot_dimension_numbers<[1], [0], [0], [1], [0, 0, 1, 1], [], []>} : vector<8x128xbf16>, vector<128x128xbf16>, vector<8x128xf32> -> vector<8x128xf32>
    %21 = vector.broadcast %19 : vector<1x128xf32> to vector<8x128xf32>
    %22 = arith.addf %20, %21 : vector<8x128xf32>
    %23 = arith.negf %22 : vector<8x128xf32>
    %24 = math.exp %23 : vector<8x128xf32>
    %cst_17 = arith.constant 1.000000e+00 : f32
    %25 = vector.broadcast %cst_17 : f32 to vector<8x128xf32>
    %26 = arith.addf %25, %24 : vector<8x128xf32>
    %27 = arith.divf %25, %26 : vector<8x128xf32>
    %c0_18 = arith.constant 0 : index
    %c0_19 = arith.constant 0 : index
    %28 = vector.load %arg8[%c0_18, %c0_19] : memref<8x128xf32, #tpu.memory_space<vmem>>, vector<8x128xf32>
    tpu.vector_store %arg8[%c0_18, %c0_19], %27 {strides = array<i32>} : memref<8x128xf32, #tpu.memory_space<vmem>>, vector<8x128xf32>,
    return
  }
  func.func @transform_0(%arg0: i32) -> (i32, i32) {
    %c0_i32 = arith.constant 0 : i32
    %c0_i32_0 = arith.constant 0 : i32
    return %arg0, %c0_i32 : i32, i32
  }
  func.func @transform_1(%arg0: i32) -> (i32, i32) {
    %c0_i32 = arith.constant 0 : i32
    %c0_i32_0 = arith.constant 0 : i32
    %c0_i32_1 = arith.constant 0 : i32
    return %c0_i32, %c0_i32_0 : i32, i32
  }
  func.func @transform_2(%arg0: i32) -> (i32, i32) {
    %c0_i32 = arith.constant 0 : i32
    %c0_i32_0 = arith.constant 0 : i32
    %c0_i32_1 = arith.constant 0 : i32
    return %c0_i32, %c0_i32_0 : i32, i32
  }
  func.func @transform_3(%arg0: i32) -> (i32, i32) {
    %c0_i32 = arith.constant 0 : i32
    %c0_i32_0 = arith.constant 0 : i32
    %c0_i32_1 = arith.constant 0 : i32
    return %c0_i32, %c0_i32_0 : i32, i32
  }
  func.func @transform_4(%arg0: i32) -> (i32, i32) {
    %c0_i32 = arith.constant 0 : i32
    %c0_i32_0 = arith.constant 0 : i32
    %c0_i32_1 = arith.constant 0 : i32
    return %c0_i32, %c0_i32_0 : i32, i32
  }
  func.func @transform_5(%arg0: i32) -> (i32, i32) {
    %c0_i32 = arith.constant 0 : i32
    %c0_i32_0 = arith.constant 0 : i32
    %c0_i32_1 = arith.constant 0 : i32
    return %c0_i32, %c0_i32_0 : i32, i32
  }
  func.func @transform_6(%arg0: i32) -> (i32, i32) {
    %c0_i32 = arith.constant 0 : i32
    %c0_i32_0 = arith.constant 0 : i32
    %c0_i32_1 = arith.constant 0 : i32
    return %c0_i32, %c0_i32_0 : i32, i32
  }
  func.func @transform_7(%arg0: i32) -> (i32, i32) {
    %c0_i32 = arith.constant 0 : i32
    %c0_i32_0 = arith.constant 0 : i32
    return %arg0, %c0_i32 : i32, i32
  }
}

</mosaic_0001>

<bundles_post_ra>
// kernel: tpu_custom_call.1
= control target key start
LH: loop header
LB: loop body
LE: loop exit
PB: predicated region body
PF: predicated region fallthrough
CT: control target
= control target key end

     0   :  { %12 = vsyncpa [#allocation3], 0  ;;  %s871_s0 = inlined_call_operand.hbm [shape: f32[8,128], index: 0, kind: input, shape index: {}]   ;;  %s872_s1 = inlined_call_operand.hbm [shape: bf16[128,128], index: 1, kind: input, shape index: {}]   ;;  %s873_s2 = inlined_call_operand.vmem [shape: f32[1,128], index: 2, kind: input, shape index: {}]   ;;  %s874_s3 = inlined_call_operand.hbm [shape: bf16[128,128], index: 3, kind: input, shape index: {}]   ;;  %s875_s4 = inlined_call_operand.vmem [shape: f32[1,128], index: 4, kind: input, shape index: {}]   ;;  %s876_s5 = inlined_call_operand.hbm [shape: bf16[128,128], index: 5, kind: input, shape index: {}]   ;;  %s877_s6 = inlined_call_operand.vmem [shape: f32[1,128], index: 6, kind: input, shape index: {}]   ;;  %s878_s7 = inlined_call_operand.hbm [shape: f32[8,128], index: 7, kind: output, shape index: {}]  }
   0x1   :  { %13 = vsyncpa [#allocation6], 0 }
   0x2   :  { %14 = vsyncpa [#allocation9], 0 }
   0x3   :  { %15 = vsyncpa [#allocation4], 0  ;;  %s714_s24 = smov [#allocation5]   ;;  %s596_s28 = scalar_lea.hbm %s872_s1, 1024 }
   0x4   :  { %s31_s25 = sshll.u32 %s714_s24, 4  ;;  %p597_p0 = scmp.ne.s32.totalorder %s872_s1, %s596_s28  ;;  %s32_s25 = int_to_ptr.vmem [resolvable:$true] %s31_s25 }
   0x5   :  { %p600_p1 = scmp.lt.u32.totalorder %s596_s28, %s872_s1 }
   0x7   :  { %p602_p2 = pnand %p600_p1, %p597_p0 }
   0x9   :  { %605 = shalt.err (!%p602_p2)
}
   0xa   :  { %s606_s10 = scalar_lea.vmem %s32_s25, 1024  ;;  %p611_p4 = scmp.lt.s32.totalorder %s32_s25, %s32_s25 }
   0xb   :  { %p607_p3 = scmp.ne.s32.totalorder %s32_s25, %s606_s10  ;;  %p612_p5 = scmp.lt.s32.totalorder %s606_s10, %s606_s10 }
   0xd   :  { %p613_p6 = por %p612_p5, %p611_p4 }
   0xf   :  { %p614_p7 = pnand %p613_p6, %p607_p3 }
  0x11   :  { %617 = shalt.err (!%p614_p7)
}
  0x12   :  { %s715_s11 = smov 64   ;;  %s716_s12 = smov 4  }
  0x13   :  { %37 = dma.hbm_to_vmem [thread:$0]  %s872_s1, 1024, %s32_s25, [#allocation6], %s715_s11, %s715_s11, %s716_s12  }
  0x14   :  { %s717_s15 = smov [#allocation2]   ;;  %s718_s17 = smov [#allocation7]  }
  0x15   :  { %s22_s16 = sshll.u32 %s717_s15, 4  ;;  %s45_s18 = sshll.u32 %s718_s17, 4  ;;  %s23_s16 = int_to_ptr.vmem [resolvable:$true] %s22_s16  ;;  %s46_s18 = int_to_ptr.vmem [resolvable:$true] %s45_s18 }
  0x16   :  { %s618_s21 = scalar_lea.hbm %s871_s0, 128 }
  0x17   :  { %p619_p8 = scmp.ne.s32.totalorder %s871_s0, %s618_s21  ;;  %p622_p9 = scmp.lt.u32.totalorder %s618_s21, %s871_s0 }
  0x19   :  { %p624_p10 = pnand %p622_p9, %p619_p8 }
  0x1b   :  { %627 = shalt.err (!%p624_p10)
}
  0x1c   :  { %s628_s1 = scalar_lea.vmem %s23_s16, 128  ;;  %p633_p12 = scmp.lt.s32.totalorder %s23_s16, %s23_s16 }
  0x1d   :  { %p629_p11 = scmp.ne.s32.totalorder %s23_s16, %s628_s1  ;;  %p634_p13 = scmp.lt.s32.totalorder %s628_s1, %s628_s1 }
  0x1f   :  { %p635_p0 = por %p634_p13, %p633_p12 }
  0x21   :  { %p636_p1 = pnand %p635_p0, %p629_p11 }
  0x23   :  { %639 = shalt.err (!%p636_p1)
}
  0x24   :  { %25 = dma.hbm_to_vmem [thread:$0]  %s871_s0, 128, %s23_s16, [#allocation3]  }
  0x25   :  { %s640_s30 = scalar_lea.hbm %s874_s3, 1024 }
  0x26   :  { %p641_p2 = scmp.ne.s32.totalorder %s874_s3, %s640_s30  ;;  %p644_p3 = scmp.lt.u32.totalorder %s640_s30, %s874_s3 }
  0x28   :  { %p646_p4 = pnand %p644_p3, %p641_p2 }
  0x2a   :  { %649 = shalt.err (!%p646_p4)
}
  0x2b   :  { %s650_s14 = scalar_lea.vmem %s46_s18, 1024  ;;  %p655_p6 = scmp.lt.s32.totalorder %s46_s18, %s46_s18 }
  0x2c   :  { %p651_p5 = scmp.ne.s32.totalorder %s46_s18, %s650_s14  ;;  %p656_p7 = scmp.lt.s32.totalorder %s650_s14, %s650_s14 }
  0x2e   :  { %p657_p8 = por %p656_p7, %p655_p6 }
  0x30   :  { %p658_p9 = pnand %p657_p8, %p651_p5 }
  0x32   :  { %661 = shalt.err (!%p658_p9)
}
  0x33   :  { %51 = dma.hbm_to_vmem [thread:$0]  %s874_s3, 1024, %s46_s18, [#allocation6], %s715_s11, %s715_s11, %s716_s12  }
  0x34   :  { %s719_s16 = smov [#allocation8]   ;;  %s662_s21 = scalar_lea.hbm %s876_s5, 1024 }
  0x35   :  { %s59_s17 = sshll.u32 %s719_s16, 4  ;;  %p663_p10 = scmp.ne.s32.totalorder %s876_s5, %s662_s21  ;;  %s60_s17 = int_to_ptr.vmem [resolvable:$true] %s59_s17 }
  0x36   :  { %p666_p11 = scmp.lt.u32.totalorder %s662_s21, %s876_s5 }
  0x38   :  { %p668_p12 = pnand %p666_p11, %p663_p10 }
  0x3a   :  { %671 = shalt.err (!%p668_p12)
}
  0x3b   :  { %s672_s1 = scalar_lea.vmem %s60_s17, 1024  ;;  %p677_p0 = scmp.lt.s32.totalorder %s60_s17, %s60_s17 }
  0x3c   :  { %p673_p13 = scmp.ne.s32.totalorder %s60_s17, %s672_s1  ;;  %p678_p1 = scmp.lt.s32.totalorder %s672_s1, %s672_s1 }
  0x3e   :  { %p679_p2 = por %p678_p1, %p677_p0 }
  0x40   :  { %p680_p3 = pnand %p679_p2, %p673_p13 }
  0x42   :  { %683 = shalt.err (!%p680_p3)
}
  0x43   :  { %65 = dma.hbm_to_vmem [thread:$0]  %s876_s5, 1024, %s60_s17, [#allocation9], %s715_s11, %s715_s11, %s716_s12  }
  0x44   :  { %706 = dma.done.wait [#allocation3], 128  }
  0x45   :  { %707 = vsyncadd [#allocation3], 4294967168 }
  0x46   :  { %708 = dma.done.wait [#allocation6], 2048  }
  0x47   :  { %709 = vsyncadd [#allocation6], 4294965248 }
  0x48   :  { %710 = dma.done.wait [#allocation9], 1024  }
  0x49   :  { %711 = vsyncadd [#allocation9], 4294966272  ;;  %v720_v0 = vmov 0.0   ;;  %vm721_vm0 = vmmov 0   ;;  %v568_v1 = vld [vmem:[#allocation5] sm:$0xff]   ;;  %v569_v2 = vld [vmem:[#allocation5 + $0x8] sm:$0xff]  }
  0x4a   :  { %499 = vmatprep.subr.bf16.mxu0 %v720_v0  ;;  %515 = vmatprep.mubr.msk.bf16.mxu0 %vm721_vm0, %v720_v0  ;;  %v570_v3 = vld [vmem:[#allocation5 + $0x10] sm:$0xff]   ;;  %v576_v4 = vld [vmem:[#allocation7] sm:$0xff]   ;;  %v571_v5 = vld [vmem:[#allocation5 + $0x18] sm:$0xff]  }
  0x4b   :  { %519 = vmatprep.subr.bf16.mxu1 %v720_v0  ;;  %535 = vmatprep.mubr.msk.bf16.mxu1 %vm721_vm0, %v720_v0  ;;  %v577_v6 = vld [vmem:[#allocation7 + $0x8] sm:$0xff]   ;;  %v572_v7 = vld [vmem:[#allocation5 + $0x20] sm:$0xff]   ;;  %v578_v8 = vld [vmem:[#allocation7 + $0x10] sm:$0xff]  }
  0x4c   :  { %500 = vmatpush3.bf16.msra.mxu0 %v568_v1  ;;  %520 = vmatpush3.bf16.msra.mxu1 %v576_v4  ;;  %v573_v9 = vld [vmem:[#allocation5 + $0x28] sm:$0xff]   ;;  %v579_v10 = vld [vmem:[#allocation7 + $0x18] sm:$0xff]   ;;  %v574_v11 = vld [vmem:[#allocation5 + $0x30] sm:$0xff]  }
  0x4d   :  { %501 = vmatprep.subr.bf16.mxu0 %v720_v0  ;;  %521 = vmatprep.subr.bf16.mxu1 %v720_v0  ;;  %v580_v12 = vld [vmem:[#allocation7 + $0x20] sm:$0xff]   ;;  %v575_v13 = vld [vmem:[#allocation5 + $0x38] sm:$0xff]   ;;  %v581_v15 = vld [vmem:[#allocation7 + $0x28] sm:$0xff]  }
  0x4e   :  { %v81_v14 = vld [vmem:[#allocation2] sm:$0xff]  ;;  %v582_v17 = vld [vmem:[#allocation7 + $0x30] sm:$0xff]   ;;  %v584_v19 = vld [vmem:[#allocation8] sm:$0xff]  }
  0x4f   :  { %v82_v16 = vpack.c.bf16 %v81_v14, %v81_v14  ;;  %v583_v18 = vld [vmem:[#allocation7 + $0x38] sm:$0xff]   ;;  %v585_v20 = vld [vmem:[#allocation8 + $0x8] sm:$0xff]   ;;  %v586_v21 = vld [vmem:[#allocation8 + $0x10] sm:$0xff]  }
  0x50   :  { %502 = vmatpush3.bf16.msra.mxu0 %v569_v2  ;;  %522 = vmatpush3.bf16.msra.mxu1 %v577_v6  ;;  %v587_v22 = vld [vmem:[#allocation8 + $0x18] sm:$0xff]   ;;  %v588_v23 = vld [vmem:[#allocation8 + $0x20] sm:$0xff]   ;;  %v589_v24 = vld [vmem:[#allocation8 + $0x28] sm:$0xff]  }
  0x51   :  { %503 = vmatprep.subr.bf16.mxu0 %v720_v0  ;;  %523 = vmatprep.subr.bf16.mxu1 %v720_v0  ;;  %v444_v25 = vld [vmem:[%s873_s2] ss:$0 sm:$0xff]  ;;  %v590_v33 = vld [vmem:[#allocation8 + $0x30] sm:$0xff]  }
  0x52   :  { %v591_v34 = vld [vmem:[#allocation8 + $0x38] sm:$0xff]  }
  0x53   :  { %v453_v35 = vld [vmem:[%s875_s4] ss:$0 sm:$0xff]  ;;  %s722_s4 = smov [#allocation10]  }
  0x54   :  { %504 = vmatpush3.bf16.msra.mxu0 %v570_v3  ;;  %524 = vmatpush3.bf16.msra.mxu1 %v578_v8  ;;  %v462_v43 = vld [vmem:[%s877_s6] ss:$0 sm:$0xff]  ;;  %s433_s28 = sshll.u32 %s722_s4, 4  ;;  %s434_s28 = int_to_ptr.vmem [resolvable:$true] %s433_s28 }
  0x55   :  { %505 = vmatprep.subr.bf16.mxu0 %v720_v0  ;;  %525 = vmatprep.subr.bf16.mxu1 %v720_v0  ;;  %s684_s29 = scalar_lea.vmem %s434_s28, 128  ;;  %p689_p5 = scmp.lt.s32.totalorder %s434_s28, %s434_s28 }
  0x56   :  { %p685_p4 = scmp.ne.s32.totalorder %s434_s28, %s684_s29  ;;  %p690_p6 = scmp.lt.s32.totalorder %s684_s29, %s684_s29 }
  0x58   :  { %506 = vmatpush3.bf16.msra.mxu0 %v571_v5  ;;  %526 = vmatpush3.bf16.msra.mxu1 %v579_v10  ;;  %p691_p7 = por %p690_p6, %p689_p5 }
  0x59   :  { %507 = vmatprep.subr.bf16.mxu0 %v720_v0  ;;  %527 = vmatprep.subr.bf16.mxu1 %v720_v0 }
  0x5a   :  { %p692_p8 = pnand %p691_p7, %p685_p4 }
  0x5c   :  { %508 = vmatpush3.bf16.msra.mxu0 %v572_v7  ;;  %528 = vmatpush3.bf16.msra.mxu1 %v580_v12 }
  0x5d   :  { %509 = vmatprep.subr.bf16.mxu0 %v720_v0  ;;  %529 = vmatprep.subr.bf16.mxu1 %v720_v0 }
  0x60   :  { %510 = vmatpush3.bf16.msra.mxu0 %v573_v9  ;;  %530 = vmatpush3.bf16.msra.mxu1 %v581_v15 }
  0x61   :  { %511 = vmatprep.subr.bf16.mxu0 %v720_v0  ;;  %531 = vmatprep.subr.bf16.mxu1 %v720_v0 }
  0x64   :  { %512 = vmatpush3.bf16.msra.mxu0 %v574_v11  ;;  %532 = vmatpush3.bf16.msra.mxu1 %v582_v17 }
  0x65   :  { %513 = vmatprep.subr.bf16.mxu0 %v720_v0  ;;  %533 = vmatprep.subr.bf16.mxu1 %v720_v0 }
  0x68   :  { %514 = vmatpush3.bf16.msra.mxu0 %v575_v13  ;;  %534 = vmatpush3.bf16.msra.mxu1 %v583_v18 }
  0x69   :  { %539 = vmatprep.subr.bf16.mxu0 %v720_v0 }
  0x6b   :  { %516 = vmatmul.mubr.bf16.vlgmr.msra.gmra.mrb[0].mxu0 %v82_v16 }
  0x6c   :  { %555 = vmatprep.mubr.msk.bf16.mxu0 %vm721_vm0, %v720_v0  ;;  %540 = vmatpush3.bf16.msra.mxu0 %v584_v19 }
  0x6d   :  { %541 = vmatprep.subr.bf16.mxu0 %v720_v0 }
  0x70   :  { %542 = vmatpush3.bf16.msra.mxu0 %v585_v20 }
  0x71   :  { %543 = vmatprep.subr.bf16.mxu0 %v720_v0 }
  0x74   :  { %544 = vmatpush3.bf16.msra.mxu0 %v586_v21 }
  0x75   :  { %545 = vmatprep.subr.bf16.mxu0 %v720_v0 }
  0x78   :  { %546 = vmatpush3.bf16.msra.mxu0 %v587_v22 }
  0x79   :  { %547 = vmatprep.subr.bf16.mxu0 %v720_v0 }
  0x7c   :  { %548 = vmatpush3.bf16.msra.mxu0 %v588_v23 }
  0x7d   :  { %549 = vmatprep.subr.bf16.mxu0 %v720_v0 }
  0x80   :  { %550 = vmatpush3.bf16.msra.mxu0 %v589_v24 }
  0x81   :  { %551 = vmatprep.subr.bf16.mxu0 %v720_v0 }
  0x84   :  { %552 = vmatpush3.bf16.msra.mxu0 %v590_v33 }
  0x85   :  { %553 = vmatprep.subr.bf16.mxu0 %v720_v0 }
  0x88   :  { %554 = vmatpush3.bf16.msra.mxu0 %v591_v34 }
 0x13e   :  { %v188_v26 = vpop.f32.mrb[0].mxu0 }
 0x13f   :  { %v189_v27 = vadd.f32 %v444_v25, %v188_v26  ;;  %v517_v28 = vpop.f32.mrb[1].mxu0 }
 0x140   :  { %v191_v29 = vpop.f32.mrb[2].mxu0 }
 0x141   :  { %v194_v30 = vmax.f32 %v189_v27, 0.0  ;;  %v518_v31 = vpop.f32.mrb[3].mxu0 }
 0x143   :  { %v195_v32 = vpack.c.bf16 %v194_v30, %v194_v30 }
 0x145   :  { %536 = vmatmul.mubr.bf16.vlgmr.msra.gmra.mrb[0].mxu1 %v195_v32 }
 0x218   :  { %v301_v36 = vpop.f32.mrb[0].mxu1 }
 0x219   :  { %v302_v37 = vadd.f32 %v453_v35, %v301_v36  ;;  %v537_v38 = vpop.f32.mrb[1].mxu1 }
 0x21a   :  { %v304_v39 = vpop.f32.mrb[2].mxu1 }
 0x21b   :  { %v307_v40 = vmax.f32 %v302_v37, 0.0  ;;  %v538_v41 = vpop.f32.mrb[3].mxu1 }
 0x21d   :  { %v308_v42 = vpack.c.bf16 %v307_v40, %v307_v40 }
 0x21f   :  { %556 = vmatmul.mubr.bf16.vlgmr.msra.gmra.mrb[4].mxu0 %v308_v42 }
 0x2f2   :  { %v414_v44 = vpop.f32.mrb[4].mxu0 }
 0x2f3   :  { %v415_v45 = vadd.f32 %v462_v43, %v414_v44  ;;  %v557_v46 = vpop.f32.mrb[5].mxu0 }
 0x2f4   :  { %v417_v47 = vpop.f32.mrb[6].mxu0 }
 0x2f5   :  { %v471_v48 = vmul.f32 -1.442695, %v415_v45  ;;  %v558_v49 = vpop.f32.mrb[7].mxu0 }
 0x2f7   :  { %592 = vpow2.f32 %v471_v48 }
 0x301   :  { %v593_v50 = vpop.eup %592 }
 0x302   :  { %v423_v51 = vadd.f32 1.0, %v593_v50 }
 0x304   :  { %594 = vrcp.f32 %v423_v51 }
 0x30e   :  { %v595_v52 = vpop.eup %594 }
 0x30f   :  { %426 = vst [vmem:[#allocation10] sm:$0xff] %v595_v52 }
 0x310   :  { %695 = shalt.err (!%p692_p8)
}
 0x311   :  { %s696_s8 = scalar_lea.hbm %s878_s7, 128 }
 0x312   :  { %p697_p9 = scmp.ne.s32.totalorder %s878_s7, %s696_s8  ;;  %p700_p10 = scmp.lt.u32.totalorder %s696_s8, %s878_s7 }
 0x314   :  { %p702_p11 = pnand %p700_p10, %p697_p9 }
 0x316   :  { %705 = shalt.err (!%p702_p11)
}
 0x317   :  { %436 = dma.vmem_to_hbm [thread:$0]  %s434_s28, 128, %s878_s7, [#allocation4]  }
 0x318   :  { %712 = dma.done.wait [#allocation4], 128  }
 0x319   :  { %713 = vsyncadd [#allocation4], 4294967168 }
 0x31a   :  { %440 = vsyncpa [#allocation3], 1 }
 0x31b   :  { %441 = vsyncpa [#allocation6], 1 }
 0x31c   :  { %442 = vsyncpa [#allocation9], 1 }
 0x31d   :  { %443 = vsyncpa [#allocation4], 1 }

// kernel: tpu_custom_call.1
= control target key start
LH: loop header
LB: loop body
LE: loop exit
PB: predicated region body
PF: predicated region fallthrough
CT: control target
= control target key end

     0   :  { %12 = vsyncpa [#allocation3], 0  ;;  %s871_s0 = inlined_call_operand.hbm [shape: f32[8,128], index: 0, kind: input, shape index: {}]   ;;  %s872_s1 = inlined_call_operand.hbm [shape: bf16[128,128], index: 1, kind: input, shape index: {}]   ;;  %s873_s2 = inlined_call_operand.vmem [shape: f32[1,128], index: 2, kind: input, shape index: {}]   ;;  %s874_s3 = inlined_call_operand.hbm [shape: bf16[128,128], index: 3, kind: input, shape index: {}]   ;;  %s875_s4 = inlined_call_operand.vmem [shape: f32[1,128], index: 4, kind: input, shape index: {}]   ;;  %s876_s5 = inlined_call_operand.hbm [shape: bf16[128,128], index: 5, kind: input, shape index: {}]   ;;  %s877_s6 = inlined_call_operand.vmem [shape: f32[1,128], index: 6, kind: input, shape index: {}]   ;;  %s878_s7 = inlined_call_operand.hbm [shape: f32[8,128], index: 7, kind: output, shape index: {}]  }
   0x1   :  { %13 = vsyncpa [#allocation6], 0 }
   0x2   :  { %14 = vsyncpa [#allocation9], 0 }
   0x3   :  { %15 = vsyncpa [#allocation4], 0  ;;  %s714_s24 = smov [#allocation5]   ;;  %s596_s28 = scalar_lea.hbm %s872_s1, 1024 }
   0x4   :  { %s31_s25 = sshll.u32 %s714_s24, 4  ;;  %p597_p0 = scmp.ne.s32.totalorder %s872_s1, %s596_s28  ;;  %s32_s25 = int_to_ptr.vmem [resolvable:$true] %s31_s25 }
   0x5   :  { %p600_p1 = scmp.lt.u32.totalorder %s596_s28, %s872_s1 }
   0x7   :  { %p602_p2 = pnand %p600_p1, %p597_p0 }
   0x9   :  { %605 = shalt.err (!%p602_p2)
}
   0xa   :  { %s606_s10 = scalar_lea.vmem %s32_s25, 1024  ;;  %p611_p4 = scmp.lt.s32.totalorder %s32_s25, %s32_s25 }
   0xb   :  { %p607_p3 = scmp.ne.s32.totalorder %s32_s25, %s606_s10  ;;  %p612_p5 = scmp.lt.s32.totalorder %s606_s10, %s606_s10 }
   0xd   :  { %p613_p6 = por %p612_p5, %p611_p4 }
   0xf   :  { %p614_p7 = pnand %p613_p6, %p607_p3 }
  0x11   :  { %617 = shalt.err (!%p614_p7)
}
  0x12   :  { %s715_s11 = smov 64   ;;  %s716_s12 = smov 4  }
  0x13   :  { %37 = dma.hbm_to_vmem [thread:$0]  %s872_s1, 1024, %s32_s25, [#allocation6], %s715_s11, %s715_s11, %s716_s12  }
  0x14   :  { %s717_s15 = smov [#allocation2]   ;;  %s718_s17 = smov [#allocation7]  }
  0x15   :  { %s22_s16 = sshll.u32 %s717_s15, 4  ;;  %s45_s18 = sshll.u32 %s718_s17, 4  ;;  %s23_s16 = int_to_ptr.vmem [resolvable:$true] %s22_s16  ;;  %s46_s18 = int_to_ptr.vmem [resolvable:$true] %s45_s18 }
  0x16   :  { %s618_s21 = scalar_lea.hbm %s871_s0, 128 }
  0x17   :  { %p619_p8 = scmp.ne.s32.totalorder %s871_s0, %s618_s21  ;;  %p622_p9 = scmp.lt.u32.totalorder %s618_s21, %s871_s0 }
  0x19   :  { %p624_p10 = pnand %p622_p9, %p619_p8 }
  0x1b   :  { %627 = shalt.err (!%p624_p10)
}
  0x1c   :  { %s628_s1 = scalar_lea.vmem %s23_s16, 128  ;;  %p633_p12 = scmp.lt.s32.totalorder %s23_s16, %s23_s16 }
  0x1d   :  { %p629_p11 = scmp.ne.s32.totalorder %s23_s16, %s628_s1  ;;  %p634_p13 = scmp.lt.s32.totalorder %s628_s1, %s628_s1 }
  0x1f   :  { %p635_p0 = por %p634_p13, %p633_p12 }
  0x21   :  { %p636_p1 = pnand %p635_p0, %p629_p11 }
  0x23   :  { %639 = shalt.err (!%p636_p1)
}
  0x24   :  { %25 = dma.hbm_to_vmem [thread:$0]  %s871_s0, 128, %s23_s16, [#allocation3]  }
  0x25   :  { %s640_s30 = scalar_lea.hbm %s874_s3, 1024 }
  0x26   :  { %p641_p2 = scmp.ne.s32.totalorder %s874_s3, %s640_s30  ;;  %p644_p3 = scmp.lt.u32.totalorder %s640_s30, %s874_s3 }
  0x28   :  { %p646_p4 = pnand %p644_p3, %p641_p2 }
  0x2a   :  { %649 = shalt.err (!%p646_p4)
}
  0x2b   :  { %s650_s14 = scalar_lea.vmem %s46_s18, 1024  ;;  %p655_p6 = scmp.lt.s32.totalorder %s46_s18, %s46_s18 }
  0x2c   :  { %p651_p5 = scmp.ne.s32.totalorder %s46_s18, %s650_s14  ;;  %p656_p7 = scmp.lt.s32.totalorder %s650_s14, %s650_s14 }
  0x2e   :  { %p657_p8 = por %p656_p7, %p655_p6 }
  0x30   :  { %p658_p9 = pnand %p657_p8, %p651_p5 }
  0x32   :  { %661 = shalt.err (!%p658_p9)
}
  0x33   :  { %51 = dma.hbm_to_vmem [thread:$0]  %s874_s3, 1024, %s46_s18, [#allocation6], %s715_s11, %s715_s11, %s716_s12  }
  0x34   :  { %s719_s16 = smov [#allocation8]   ;;  %s662_s21 = scalar_lea.hbm %s876_s5, 1024 }
  0x35   :  { %s59_s17 = sshll.u32 %s719_s16, 4  ;;  %p663_p10 = scmp.ne.s32.totalorder %s876_s5, %s662_s21  ;;  %s60_s17 = int_to_ptr.vmem [resolvable:$true] %s59_s17 }
  0x36   :  { %p666_p11 = scmp.lt.u32.totalorder %s662_s21, %s876_s5 }
  0x38   :  { %p668_p12 = pnand %p666_p11, %p663_p10 }
  0x3a   :  { %671 = shalt.err (!%p668_p12)
}
  0x3b   :  { %s672_s1 = scalar_lea.vmem %s60_s17, 1024  ;;  %p677_p0 = scmp.lt.s32.totalorder %s60_s17, %s60_s17 }
  0x3c   :  { %p673_p13 = scmp.ne.s32.totalorder %s60_s17, %s672_s1  ;;  %p678_p1 = scmp.lt.s32.totalorder %s672_s1, %s672_s1 }
  0x3e   :  { %p679_p2 = por %p678_p1, %p677_p0 }
  0x40   :  { %p680_p3 = pnand %p679_p2, %p673_p13 }
  0x42   :  { %683 = shalt.err (!%p680_p3)
}
  0x43   :  { %65 = dma.hbm_to_vmem [thread:$0]  %s876_s5, 1024, %s60_s17, [#allocation9], %s715_s11, %s715_s11, %s716_s12  }
  0x44   :  { %706 = dma.done.wait [#allocation3], 128  }
  0x45   :  { %707 = vsyncadd [#allocation3], 4294967168 }
  0x46   :  { %708 = dma.done.wait [#allocation6], 2048  }
  0x47   :  { %709 = vsyncadd [#allocation6], 4294965248 }
  0x48   :  { %710 = dma.done.wait [#allocation9], 1024  }
  0x49   :  { %711 = vsyncadd [#allocation9], 4294966272  ;;  %v720_v0 = vmov 0.0   ;;  %vm721_vm0 = vmmov 0   ;;  %v568_v1 = vld [vmem:[#allocation5] sm:$0xff]   ;;  %v569_v2 = vld [vmem:[#allocation5 + $0x8] sm:$0xff]  }
  0x4a   :  { %499 = vmatprep.subr.bf16.mxu0 %v720_v0  ;;  %515 = vmatprep.mubr.msk.bf16.mxu0 %vm721_vm0, %v720_v0  ;;  %v570_v3 = vld [vmem:[#allocation5 + $0x10] sm:$0xff]   ;;  %v576_v4 = vld [vmem:[#allocation7] sm:$0xff]   ;;  %v571_v5 = vld [vmem:[#allocation5 + $0x18] sm:$0xff]  }
  0x4b   :  { %519 = vmatprep.subr.bf16.mxu1 %v720_v0  ;;  %535 = vmatprep.mubr.msk.bf16.mxu1 %vm721_vm0, %v720_v0  ;;  %v577_v6 = vld [vmem:[#allocation7 + $0x8] sm:$0xff]   ;;  %v572_v7 = vld [vmem:[#allocation5 + $0x20] sm:$0xff]   ;;  %v578_v8 = vld [vmem:[#allocation7 + $0x10] sm:$0xff]  }
  0x4c   :  { %500 = vmatpush3.bf16.msra.mxu0 %v568_v1  ;;  %520 = vmatpush3.bf16.msra.mxu1 %v576_v4  ;;  %v573_v9 = vld [vmem:[#allocation5 + $0x28] sm:$0xff]   ;;  %v579_v10 = vld [vmem:[#allocation7 + $0x18] sm:$0xff]   ;;  %v574_v11 = vld [vmem:[#allocation5 + $0x30] sm:$0xff]  }
  0x4d   :  { %501 = vmatprep.subr.bf16.mxu0 %v720_v0  ;;  %521 = vmatprep.subr.bf16.mxu1 %v720_v0  ;;  %v580_v12 = vld [vmem:[#allocation7 + $0x20] sm:$0xff]   ;;  %v575_v13 = vld [vmem:[#allocation5 + $0x38] sm:$0xff]   ;;  %v581_v15 = vld [vmem:[#allocation7 + $0x28] sm:$0xff]  }
  0x4e   :  { %v81_v14 = vld [vmem:[#allocation2] sm:$0xff]  ;;  %v582_v17 = vld [vmem:[#allocation7 + $0x30] sm:$0xff]   ;;  %v584_v19 = vld [vmem:[#allocation8] sm:$0xff]  }
  0x4f   :  { %v82_v16 = vpack.c.bf16 %v81_v14, %v81_v14  ;;  %v583_v18 = vld [vmem:[#allocation7 + $0x38] sm:$0xff]   ;;  %v585_v20 = vld [vmem:[#allocation8 + $0x8] sm:$0xff]   ;;  %v586_v21 = vld [vmem:[#allocation8 + $0x10] sm:$0xff]  }
  0x50   :  { %502 = vmatpush3.bf16.msra.mxu0 %v569_v2  ;;  %522 = vmatpush3.bf16.msra.mxu1 %v577_v6  ;;  %v587_v22 = vld [vmem:[#allocation8 + $0x18] sm:$0xff]   ;;  %v588_v23 = vld [vmem:[#allocation8 + $0x20] sm:$0xff]   ;;  %v589_v24 = vld [vmem:[#allocation8 + $0x28] sm:$0xff]  }
  0x51   :  { %503 = vmatprep.subr.bf16.mxu0 %v720_v0  ;;  %523 = vmatprep.subr.bf16.mxu1 %v720_v0  ;;  %v444_v25 = vld [vmem:[%s873_s2] ss:$0 sm:$0xff]  ;;  %v590_v33 = vld [vmem:[#allocation8 + $0x30] sm:$0xff]  }
  0x52   :  { %v591_v34 = vld [vmem:[#allocation8 + $0x38] sm:$0xff]  }
  0x53   :  { %v453_v35 = vld [vmem:[%s875_s4] ss:$0 sm:$0xff]  ;;  %s722_s4 = smov [#allocation10]  }
  0x54   :  { %504 = vmatpush3.bf16.msra.mxu0 %v570_v3  ;;  %524 = vmatpush3.bf16.msra.mxu1 %v578_v8  ;;  %v462_v43 = vld [vmem:[%s877_s6] ss:$0 sm:$0xff]  ;;  %s433_s28 = sshll.u32 %s722_s4, 4  ;;  %s434_s28 = int_to_ptr.vmem [resolvable:$true] %s433_s28 }
  0x55   :  { %505 = vmatprep.subr.bf16.mxu0 %v720_v0  ;;  %525 = vmatprep.subr.bf16.mxu1 %v720_v0  ;;  %s684_s29 = scalar_lea.vmem %s434_s28, 128  ;;  %p689_p5 = scmp.lt.s32.totalorder %s434_s28, %s434_s28 }
  0x56   :  { %p685_p4 = scmp.ne.s32.totalorder %s434_s28, %s684_s29  ;;  %p690_p6 = scmp.lt.s32.totalorder %s684_s29, %s684_s29 }
  0x58   :  { %506 = vmatpush3.bf16.msra.mxu0 %v571_v5  ;;  %526 = vmatpush3.bf16.msra.mxu1 %v579_v10  ;;  %p691_p7 = por %p690_p6, %p689_p5 }
  0x59   :  { %507 = vmatprep.subr.bf16.mxu0 %v720_v0  ;;  %527 = vmatprep.subr.bf16.mxu1 %v720_v0 }
  0x5a   :  { %p692_p8 = pnand %p691_p7, %p685_p4 }
  0x5c   :  { %508 = vmatpush3.bf16.msra.mxu0 %v572_v7  ;;  %528 = vmatpush3.bf16.msra.mxu1 %v580_v12 }
  0x5d   :  { %509 = vmatprep.subr.bf16.mxu0 %v720_v0  ;;  %529 = vmatprep.subr.bf16.mxu1 %v720_v0 }
  0x60   :  { %510 = vmatpush3.bf16.msra.mxu0 %v573_v9  ;;  %530 = vmatpush3.bf16.msra.mxu1 %v581_v15 }
  0x61   :  { %511 = vmatprep.subr.bf16.mxu0 %v720_v0  ;;  %531 = vmatprep.subr.bf16.mxu1 %v720_v0 }
  0x64   :  { %512 = vmatpush3.bf16.msra.mxu0 %v574_v11  ;;  %532 = vmatpush3.bf16.msra.mxu1 %v582_v17 }
  0x65   :  { %513 = vmatprep.subr.bf16.mxu0 %v720_v0  ;;  %533 = vmatprep.subr.bf16.mxu1 %v720_v0 }
  0x68   :  { %514 = vmatpush3.bf16.msra.mxu0 %v575_v13  ;;  %534 = vmatpush3.bf16.msra.mxu1 %v583_v18 }
  0x69   :  { %539 = vmatprep.subr.bf16.mxu0 %v720_v0 }
  0x6b   :  { %516 = vmatmul.mubr.bf16.vlgmr.msra.gmra.mrb[0].mxu0 %v82_v16 }
  0x6c   :  { %555 = vmatprep.mubr.msk.bf16.mxu0 %vm721_vm0, %v720_v0  ;;  %540 = vmatpush3.bf16.msra.mxu0 %v584_v19 }
  0x6d   :  { %541 = vmatprep.subr.bf16.mxu0 %v720_v0 }
  0x70   :  { %542 = vmatpush3.bf16.msra.mxu0 %v585_v20 }
  0x71   :  { %543 = vmatprep.subr.bf16.mxu0 %v720_v0 }
  0x74   :  { %544 = vmatpush3.bf16.msra.mxu0 %v586_v21 }
  0x75   :  { %545 = vmatprep.subr.bf16.mxu0 %v720_v0 }
  0x78   :  { %546 = vmatpush3.bf16.msra.mxu0 %v587_v22 }
  0x79   :  { %547 = vmatprep.subr.bf16.mxu0 %v720_v0 }
  0x7c   :  { %548 = vmatpush3.bf16.msra.mxu0 %v588_v23 }
  0x7d   :  { %549 = vmatprep.subr.bf16.mxu0 %v720_v0 }
  0x80   :  { %550 = vmatpush3.bf16.msra.mxu0 %v589_v24 }
  0x81   :  { %551 = vmatprep.subr.bf16.mxu0 %v720_v0 }
  0x84   :  { %552 = vmatpush3.bf16.msra.mxu0 %v590_v33 }
  0x85   :  { %553 = vmatprep.subr.bf16.mxu0 %v720_v0 }
  0x88   :  { %554 = vmatpush3.bf16.msra.mxu0 %v591_v34 }
 0x13e   :  { %v188_v26 = vpop.f32.mrb[0].mxu0 }
 0x13f   :  { %v189_v27 = vadd.f32 %v444_v25, %v188_v26  ;;  %v517_v28 = vpop.f32.mrb[1].mxu0 }
 0x140   :  { %v191_v29 = vpop.f32.mrb[2].mxu0 }
 0x141   :  { %v194_v30 = vmax.f32 %v189_v27, 0.0  ;;  %v518_v31 = vpop.f32.mrb[3].mxu0 }
 0x143   :  { %v195_v32 = vpack.c.bf16 %v194_v30, %v194_v30 }
 0x145   :  { %536 = vmatmul.mubr.bf16.vlgmr.msra.gmra.mrb[0].mxu1 %v195_v32 }
 0x218   :  { %v301_v36 = vpop.f32.mrb[0].mxu1 }
 0x219   :  { %v302_v37 = vadd.f32 %v453_v35, %v301_v36  ;;  %v537_v38 = vpop.f32.mrb[1].mxu1 }
 0x21a   :  { %v304_v39 = vpop.f32.mrb[2].mxu1 }
 0x21b   :  { %v307_v40 = vmax.f32 %v302_v37, 0.0  ;;  %v538_v41 = vpop.f32.mrb[3].mxu1 }
 0x21d   :  { %v308_v42 = vpack.c.bf16 %v307_v40, %v307_v40 }
 0x21f   :  { %556 = vmatmul.mubr.bf16.vlgmr.msra.gmra.mrb[4].mxu0 %v308_v42 }
 0x2f2   :  { %v414_v44 = vpop.f32.mrb[4].mxu0 }
 0x2f3   :  { %v415_v45 = vadd.f32 %v462_v43, %v414_v44  ;;  %v557_v46 = vpop.f32.mrb[5].mxu0 }
 0x2f4   :  { %v417_v47 = vpop.f32.mrb[6].mxu0 }
 0x2f5   :  { %v471_v48 = vmul.f32 -1.442695, %v415_v45  ;;  %v558_v49 = vpop.f32.mrb[7].mxu0 }
 0x2f7   :  { %592 = vpow2.f32 %v471_v48 }
 0x301   :  { %v593_v50 = vpop.eup %592 }
 0x302   :  { %v423_v51 = vadd.f32 1.0, %v593_v50 }
 0x304   :  { %594 = vrcp.f32 %v423_v51 }
 0x30e   :  { %v595_v52 = vpop.eup %594 }
 0x30f   :  { %426 = vst [vmem:[#allocation10] sm:$0xff] %v595_v52 }
 0x310   :  { %695 = shalt.err (!%p692_p8)
}
 0x311   :  { %s696_s8 = scalar_lea.hbm %s878_s7, 128 }
 0x312   :  { %p697_p9 = scmp.ne.s32.totalorder %s878_s7, %s696_s8  ;;  %p700_p10 = scmp.lt.u32.totalorder %s696_s8, %s878_s7 }
 0x314   :  { %p702_p11 = pnand %p700_p10, %p697_p9 }
 0x316   :  { %705 = shalt.err (!%p702_p11)
}
 0x317   :  { %436 = dma.vmem_to_hbm [thread:$0]  %s434_s28, 128, %s878_s7, [#allocation4]  }
 0x318   :  { %712 = dma.done.wait [#allocation4], 128  }
 0x319   :  { %713 = vsyncadd [#allocation4], 4294967168 }
 0x31a   :  { %440 = vsyncpa [#allocation3], 1 }
 0x31b   :  { %441 = vsyncpa [#allocation6], 1 }
 0x31c   :  { %442 = vsyncpa [#allocation9], 1 }
 0x31d   :  { %443 = vsyncpa [#allocation4], 1 }

</bundles_post_ra>
